<compile_context>
chip_gen: v7x
topology: tpu7x:2x2x1
jax: 0.10.0
libtpu: 0.0.40
codegen_flags: <defaults>
</compile_context>

<pallas_src>
import functools

import jax
import jax.numpy as jnp
from jax.experimental import pallas as pl
from jax.experimental.pallas import tpu as pltpu

EPS = 1e-5  # PyTorch InstanceNorm2d default (affine=False, biased variance)


def _resnet_block_kernel(x_ref, w1_ref, w2_ref, mask_ref, o_ref, *, W, compute_dtype):
    """One batch image per grid step.

    x_ref, o_ref   : (1, C, H*W)  lane-dense activation slabs
    w1_ref, w2_ref : (C, 9*C)     conv weights, K ordered (kh, kw, c_in), compute dtype
    mask_ref       : (9, H*W)     0/1 border-validity mask per tap in the compute dtype
                                  (turns the circular roll into zero "same" padding)
    """
    C = x_ref.shape[1]

    def conv3x3(y, w_ref):
        """(C, HW) float -> (C, HW) f32: 3x3 'same' conv as 9 accumulating MXU dots."""
        yc = y.astype(compute_dtype)              # cast once; taps stay in compute dtype
        acc = None
        for kh in range(3):
            for kw in range(3):
                dh, dw = kh - 1, kw - 1
                k = kh * 3 + kw
                s = dh * W + dw                   # flat spatial shift of this tap
                # t[p] = yc[(p + s) mod HW]; wrapped border pixels are zeroed by the mask.
                t = yc if s == 0 else jnp.roll(yc, shift=-s, axis=1)
                if dh != 0 or dw != 0:
                    t = t * mask_ref[pl.ds(k, 1), :]      # 0/1 mask, exact in bf16
                part = jnp.dot(w_ref[:, k * C:(k + 1) * C], t,
                               preferred_element_type=jnp.float32)
                acc = part if acc is None else acc + part
        return acc

    def instance_norm(y, *, relu):
        """Per-channel normalization over spatial dims (biased variance, eps=1e-5)."""
        mean = jnp.mean(y, axis=-1, keepdims=True)
        mean_sq = jnp.mean(y * y, axis=-1, keepdims=True)
        var = jnp.maximum(mean_sq - mean * mean, 0.0)
        out = (y - mean) * jax.lax.rsqrt(var + EPS)       # rsqrt -> EUP slot
        return jnp.maximum(out, 0.0) if relu else out     # ReLU fused into the write

    h = instance_norm(conv3x3(x_ref[0], w1_ref), relu=True)
    h = instance_norm(conv3x3(h, w2_ref), relu=False)
    # Residual: re-read x from its (still resident) input block instead of keeping an
    # f32 copy live across the whole body.
    o_ref[0] = (x_ref[0].astype(jnp.float32) + h).astype(o_ref.dtype)


def _vmem_limit_bytes() -> int:
    phys = 128 * 1024 * 1024                      # v5e/v6e physical VMEM per TensorCore
    try:
        phys = int(getattr(pltpu.get_tpu_info(), "vmem_capacity_bytes", phys))
    except Exception:
        pass                                      # interpret mode / older jax: keep default
    # 3/4 of physical: ~96 MiB on v5e/v6e (scoped default is only 16/32 MiB there),
    # ~48 MiB on v7x (64 MiB physical) -- generation-aware per the review.
    return min(phys * 3 // 4, 96 * 1024 * 1024)


def resnet_block(x, w1, b1, w2, b2, *, compute_dtype=jnp.bfloat16):
    """x: (N, C, H, W); w*: (C, C, 3, 3) OIHW; b*: (C,).

    b1/b2 are accepted for API parity with the PyTorch module but dropped: a per-channel
    conv bias followed by a non-affine InstanceNorm is exactly cancelled by the mean
    subtraction.  (Only valid while the norm stays affine=False, as in nn.InstanceNorm2d's
    default.)
    """
    N, C, H, W = x.shape
    HW = H * W
    del b1, b2

    # OIHW -> (C_out, 9*C_in), K ordered (kh, kw, c_in), stored in the MXU compute dtype.
    w1m = jnp.transpose(w1, (0, 2, 3, 1)).reshape(C, 9 * C).astype(compute_dtype)
    w2m = jnp.transpose(w2, (0, 2, 3, 1)).reshape(C, 9 * C).astype(compute_dtype)

    # Border-validity mask for each of the 9 taps: 1.0 where the (dh, dw)-shifted source
    # pixel lies inside the image, 0.0 where the circular roll wrapped across a border.
    r = jnp.arange(H, dtype=jnp.int32)[:, None]
    c = jnp.arange(W, dtype=jnp.int32)[None, :]
    masks = []
    for dh in (-1, 0, 1):
        for dw in (-1, 0, 1):
            ok = (r + dh >= 0) & (r + dh < H) & (c + dw >= 0) & (c + dw < W)
            masks.append(ok.reshape(-1))
    tap_mask = jnp.stack(masks).astype(compute_dtype)      # (9, HW), applied post-cast

    x_flat = x.reshape(N, C, HW)                            # lane-dense spatial slab

    kernel = functools.partial(_resnet_block_kernel, W=W, compute_dtype=compute_dtype)
    out = pl.pallas_call(
        kernel,
        out_shape=jax.ShapeDtypeStruct((N, C, HW), x.dtype),
        grid=(N,),
        in_specs=[
            pl.BlockSpec((1, C, HW), lambda i: (i, 0, 0)),
            pl.BlockSpec((C, 9 * C), lambda i: (0, 0)),
            pl.BlockSpec((C, 9 * C), lambda i: (0, 0)),
            pl.BlockSpec((9, HW), lambda i: (0, 0)),
        ],
        out_specs=pl.BlockSpec((1, C, HW), lambda i: (i, 0, 0)),
        compiler_params=pltpu.CompilerParams(
            dimension_semantics=("parallel",),
            vmem_limit_bytes=_vmem_limit_bytes(),
        ),
    )(x_flat, w1m, w2m, tap_mask)

    # TODO(synk): at production CycleGAN sizes (C=256, H=W=64) on v7x, tile the spatial
    # axis (1-row halo + two-pass per-channel InstanceNorm stats) and add a second
    # "parallel" grid axis so both TensorCores stay busy when N is small; at tiny C,
    # fold the whole batch into one grid step to amortize the ~0.35 us per-step overhead.
    return out.reshape(N, C, H, W)


def ref_forward(x, w1, b1, w2, b2):
    """Pure-JAX reference matching PyTorch semantics (zero padding, no norm affine)."""
    def conv(y, w, b):
        out = jax.lax.conv_general_dilated(
            y, w, window_strides=(1, 1), padding=((1, 1), (1, 1)),
            dimension_numbers=("NCHW", "OIHW", "NCHW"))
        return out + b[None, :, None, None]

    def inorm(y):
        m = y.mean(axis=(2, 3), keepdims=True)
        v = ((y - m) ** 2).mean(axis=(2, 3), keepdims=True)
        return (y - m) / jnp.sqrt(v + EPS)

    h = jnp.maximum(inorm(conv(x, w1, b1)), 0.0)
    h = inorm(conv(h, w2, b2))
    return x + h


if __name__ == "__main__":
    N, C, H, W = 2, 8, 16, 16  # dim = 8

    key = jax.random.PRNGKey(0)
    kx, k1, k2, k3, k4 = jax.random.split(key, 5)
    x = jax.random.normal(kx, (N, C, H, W), jnp.float32)
    w1 = 0.1 * jax.random.normal(k1, (C, C, 3, 3), jnp.float32)
    b1 = 0.1 * jax.random.normal(k2, (C,), jnp.float32)
    w2 = 0.1 * jax.random.normal(k3, (C, C, 3, 3), jnp.float32)
    b2 = 0.1 * jax.random.normal(k4, (C,), jnp.float32)

    ref = jax.block_until_ready(ref_forward(x, w1, b1, w2, b2))

    # f32 compute path: tight correctness check against the XLA reference.
    out_f32 = jax.block_until_ready(
        resnet_block(x, w1, b1, w2, b2, compute_dtype=jnp.float32))
    assert out_f32.shape == x.shape and out_f32.dtype == x.dtype
    assert jnp.allclose(out_f32, ref, atol=1e-3, rtol=1e-3), "f32 mismatch vs reference"

    # bf16 MXU path (default / performance configuration): looser tolerance since the
    # matmul operands are rounded to bf16 (accumulation, norms and residual stay f32).
    out_bf16 = jax.block_until_ready(resnet_block(x, w1, b1, w2, b2))
    assert out_bf16.shape == x.shape and out_bf16.dtype == x.dtype
    assert jnp.allclose(out_bf16, ref, atol=5e-2, rtol=5e-2), "bf16 mismatch vs reference"

    print("KERNEL_OK")
</pallas_src>

<mosaic_0001>
module attributes {stable_mosaic.version = 11 : i64} {
  func.func @_resnet_block_kernel(%arg0: i32, %arg1: memref<1x8x256xf32, #tpu.memory_space<vmem>>, %arg2: memref<8x72xf32, #tpu.memory_space<vmem>>, %arg3: memref<8x72xf32, #tpu.memory_space<vmem>>, %arg4: memref<9x256xf32, #tpu.memory_space<vmem>>, %arg5: memref<1x8x256xf32, #tpu.memory_space<vmem>>) attributes {dimension_semantics = [#tpu.dimension_semantics<parallel>], iteration_bounds = array<i64: 2>, scalar_prefetch = 0 : i64, scratch_operands = 0 : i64, tpu.core_type = #tpu.core_type<tc>, window_params = [{transform_indices = @transform_0, window_bounds = array<i64: 1, 8, 256>}, {pipeline_mode = #tpu.pipeline_mode<synchronous>, transform_indices = @transform_1, window_bounds = array<i64: 8, 72>}, {pipeline_mode = #tpu.pipeline_mode<synchronous>, transform_indices = @transform_2, window_bounds = array<i64: 8, 72>}, {pipeline_mode = #tpu.pipeline_mode<synchronous>, transform_indices = @transform_3, window_bounds = array<i64: 9, 256>}, {transform_indices = @transform_4, window_bounds = array<i64: 1, 8, 256>}]} {
    %c0 = arith.constant 0 : index
    %c0_0 = arith.constant 0 : index
    %c0_1 = arith.constant 0 : index
    %0 = vector.load %arg1[%c0, %c0_0, %c0_1] : memref<1x8x256xf32, #tpu.memory_space<vmem>>, vector<1x8x256xf32>
    %1 = vector.shape_cast %0 : vector<1x8x256xf32> to vector<8x256xf32>
    %2 = vector.extract_strided_slice %1 {offsets = [0, 239], sizes = [8, 17], strides = [1, 1]} : vector<8x256xf32> to vector<8x17xf32>
    %3 = vector.extract_strided_slice %1 {offsets = [0, 0], sizes = [8, 239], strides = [1, 1]} : vector<8x256xf32> to vector<8x239xf32>
    %4 = tpu.concatenate %2, %3 in 1 : vector<8x17xf32>, vector<8x239xf32> -> vector<8x256xf32>
    %c0_2 = arith.constant 0 : index
    %c0_3 = arith.constant 0 : index
    %5 = vector.load %arg4[%c0_2, %c0_3] : memref<9x256xf32, #tpu.memory_space<vmem>>, vector<1x256xf32>
    %6 = vector.broadcast %5 : vector<1x256xf32> to vector<8x256xf32>
    %7 = arith.mulf %4, %6 : vector<8x256xf32>
    %c0_4 = arith.constant 0 : index
    %c0_5 = arith.constant 0 : index
    %8 = vector.load %arg2[%c0_4, %c0_5] : memref<8x72xf32, #tpu.memory_space<vmem>>, vector<8x8xf32>
    %cst = arith.constant dense<0.000000e+00> : vector<8x256xf32>
    %9 = tpu.matmul %8, %7, %cst {dimension_numbers = #tpu.dot_dimension_numbers<[1], [0], [0], [1], [0, 0, 1, 1], [], []>} : vector<8x8xf32>, vector<8x256xf32>, vector<8x256xf32> -> vector<8x256xf32>
    %10 = vector.extract_strided_slice %1 {offsets = [0, 240], sizes = [8, 16], strides = [1, 1]} : vector<8x256xf32> to vector<8x16xf32>
    %11 = vector.extract_strided_slice %1 {offsets = [0, 0], sizes = [8, 240], strides = [1, 1]} : vector<8x256xf32> to vector<8x240xf32>
    %12 = tpu.concatenate %10, %11 in 1 : vector<8x16xf32>, vector<8x240xf32> -> vector<8x256xf32>
    %c1 = arith.constant 1 : index
    %c0_6 = arith.constant 0 : index
    %13 = vector.load %arg4[%c1, %c0_6] : memref<9x256xf32, #tpu.memory_space<vmem>>, vector<1x256xf32>
    %14 = vector.broadcast %13 : vector<1x256xf32> to vector<8x256xf32>
    %15 = arith.mulf %12, %14 : vector<8x256xf32>
    %c0_7 = arith.constant 0 : index
    %c8 = arith.constant 8 : index
    %16 = vector.load %arg2[%c0_7, %c8] : memref<8x72xf32, #tpu.memory_space<vmem>>, vector<8x8xf32>
    %cst_8 = arith.constant dense<0.000000e+00> : vector<8x256xf32>
    %17 = tpu.matmul %16, %15, %cst_8 {dimension_numbers = #tpu.dot_dimension_numbers<[1], [0], [0], [1], [0, 0, 1, 1], [], []>} : vector<8x8xf32>, vector<8x256xf32>, vector<8x256xf32> -> vector<8x256xf32>
    %18 = arith.addf %9, %17 : vector<8x256xf32>
    %19 = vector.extract_strided_slice %1 {offsets = [0, 241], sizes = [8, 15], strides = [1, 1]} : vector<8x256xf32> to vector<8x15xf32>
    %20 = vector.extract_strided_slice %1 {offsets = [0, 0], sizes = [8, 241], strides = [1, 1]} : vector<8x256xf32> to vector<8x241xf32>
    %21 = tpu.concatenate %19, %20 in 1 : vector<8x15xf32>, vector<8x241xf32> -> vector<8x256xf32>
    %c2 = arith.constant 2 : index
    %c0_9 = arith.constant 0 : index
    %22 = vector.load %arg4[%c2, %c0_9] : memref<9x256xf32, #tpu.memory_space<vmem>>, vector<1x256xf32>
    %23 = vector.broadcast %22 : vector<1x256xf32> to vector<8x256xf32>
    %24 = arith.mulf %21, %23 : vector<8x256xf32>
    %c0_10 = arith.constant 0 : index
    %c16 = arith.constant 16 : index
    %25 = vector.load %arg2[%c0_10, %c16] : memref<8x72xf32, #tpu.memory_space<vmem>>, vector<8x8xf32>
    %cst_11 = arith.constant dense<0.000000e+00> : vector<8x256xf32>
    %26 = tpu.matmul %25, %24, %cst_11 {dimension_numbers = #tpu.dot_dimension_numbers<[1], [0], [0], [1], [0, 0, 1, 1], [], []>} : vector<8x8xf32>, vector<8x256xf32>, vector<8x256xf32> -> vector<8x256xf32>
    %27 = arith.addf %18, %26 : vector<8x256xf32>
    %28 = vector.extract_strided_slice %1 {offsets = [0, 255], sizes = [8, 1], strides = [1, 1]} : vector<8x256xf32> to vector<8x1xf32>
    %29 = vector.extract_strided_slice %1 {offsets = [0, 0], sizes = [8, 255], strides = [1, 1]} : vector<8x256xf32> to vector<8x255xf32>
    %30 = tpu.concatenate %28, %29 in 1 : vector<8x1xf32>, vector<8x255xf32> -> vector<8x256xf32>
    %c3 = arith.constant 3 : index
    %c0_12 = arith.constant 0 : index
    %31 = vector.load %arg4[%c3, %c0_12] : memref<9x256xf32, #tpu.memory_space<vmem>>, vector<1x256xf32>
    %32 = vector.broadcast %31 : vector<1x256xf32> to vector<8x256xf32>
    %33 = arith.mulf %30, %32 : vector<8x256xf32>
    %c0_13 = arith.constant 0 : index
    %c24 = arith.constant 24 : index
    %34 = vector.load %arg2[%c0_13, %c24] : memref<8x72xf32, #tpu.memory_space<vmem>>, vector<8x8xf32>
    %cst_14 = arith.constant dense<0.000000e+00> : vector<8x256xf32>
    %35 = tpu.matmul %34, %33, %cst_14 {dimension_numbers = #tpu.dot_dimension_numbers<[1], [0], [0], [1], [0, 0, 1, 1], [], []>} : vector<8x8xf32>, vector<8x256xf32>, vector<8x256xf32> -> vector<8x256xf32>
    %36 = arith.addf %27, %35 : vector<8x256xf32>
    %c0_15 = arith.constant 0 : index
    %c32 = arith.constant 32 : index
    %37 = vector.load %arg2[%c0_15, %c32] : memref<8x72xf32, #tpu.memory_space<vmem>>, vector<8x8xf32>
    %cst_16 = arith.constant dense<0.000000e+00> : vector<8x256xf32>
    %38 = tpu.matmul %37, %1, %cst_16 {dimension_numbers = #tpu.dot_dimension_numbers<[1], [0], [0], [1], [0, 0, 1, 1], [], []>} : vector<8x8xf32>, vector<8x256xf32>, vector<8x256xf32> -> vector<8x256xf32>
    %39 = arith.addf %36, %38 : vector<8x256xf32>
    %40 = vector.extract_strided_slice %1 {offsets = [0, 1], sizes = [8, 255], strides = [1, 1]} : vector<8x256xf32> to vector<8x255xf32>
    %41 = vector.extract_strided_slice %1 {offsets = [0, 0], sizes = [8, 1], strides = [1, 1]} : vector<8x256xf32> to vector<8x1xf32>
    %42 = tpu.concatenate %40, %41 in 1 : vector<8x255xf32>, vector<8x1xf32> -> vector<8x256xf32>
    %c5 = arith.constant 5 : index
    %c0_17 = arith.constant 0 : index
    %43 = vector.load %arg4[%c5, %c0_17] : memref<9x256xf32, #tpu.memory_space<vmem>>, vector<1x256xf32>
    %44 = vector.broadcast %43 : vector<1x256xf32> to vector<8x256xf32>
    %45 = arith.mulf %42, %44 : vector<8x256xf32>
    %c0_18 = arith.constant 0 : index
    %c40 = arith.constant 40 : index
    %46 = vector.load %arg2[%c0_18, %c40] : memref<8x72xf32, #tpu.memory_space<vmem>>, vector<8x8xf32>
    %cst_19 = arith.constant dense<0.000000e+00> : vector<8x256xf32>
    %47 = tpu.matmul %46, %45, %cst_19 {dimension_numbers = #tpu.dot_dimension_numbers<[1], [0], [0], [1], [0, 0, 1, 1], [], []>} : vector<8x8xf32>, vector<8x256xf32>, vector<8x256xf32> -> vector<8x256xf32>
    %48 = arith.addf %39, %47 : vector<8x256xf32>
    %49 = vector.extract_strided_slice %1 {offsets = [0, 15], sizes = [8, 241], strides = [1, 1]} : vector<8x256xf32> to vector<8x241xf32>
    %50 = vector.extract_strided_slice %1 {offsets = [0, 0], sizes = [8, 15], strides = [1, 1]} : vector<8x256xf32> to vector<8x15xf32>
    %51 = tpu.concatenate %49, %50 in 1 : vector<8x241xf32>, vector<8x15xf32> -> vector<8x256xf32>
    %c6 = arith.constant 6 : index
    %c0_20 = arith.constant 0 : index
    %52 = vector.load %arg4[%c6, %c0_20] : memref<9x256xf32, #tpu.memory_space<vmem>>, vector<1x256xf32>
    %53 = vector.broadcast %52 : vector<1x256xf32> to vector<8x256xf32>
    %54 = arith.mulf %51, %53 : vector<8x256xf32>
    %c0_21 = arith.constant 0 : index
    %c48 = arith.constant 48 : index
    %55 = vector.load %arg2[%c0_21, %c48] : memref<8x72xf32, #tpu.memory_space<vmem>>, vector<8x8xf32>
    %cst_22 = arith.constant dense<0.000000e+00> : vector<8x256xf32>
    %56 = tpu.matmul %55, %54, %cst_22 {dimension_numbers = #tpu.dot_dimension_numbers<[1], [0], [0], [1], [0, 0, 1, 1], [], []>} : vector<8x8xf32>, vector<8x256xf32>, vector<8x256xf32> -> vector<8x256xf32>
    %57 = arith.addf %48, %56 : vector<8x256xf32>
    %58 = vector.extract_strided_slice %1 {offsets = [0, 16], sizes = [8, 240], strides = [1, 1]} : vector<8x256xf32> to vector<8x240xf32>
    %59 = vector.extract_strided_slice %1 {offsets = [0, 0], sizes = [8, 16], strides = [1, 1]} : vector<8x256xf32> to vector<8x16xf32>
    %60 = tpu.concatenate %58, %59 in 1 : vector<8x240xf32>, vector<8x16xf32> -> vector<8x256xf32>
    %c7 = arith.constant 7 : index
    %c0_23 = arith.constant 0 : index
    %61 = vector.load %arg4[%c7, %c0_23] : memref<9x256xf32, #tpu.memory_space<vmem>>, vector<1x256xf32>
    %62 = vector.broadcast %61 : vector<1x256xf32> to vector<8x256xf32>
    %63 = arith.mulf %60, %62 : vector<8x256xf32>
    %c0_24 = arith.constant 0 : index
    %c56 = arith.constant 56 : index
    %64 = vector.load %arg2[%c0_24, %c56] : memref<8x72xf32, #tpu.memory_space<vmem>>, vector<8x8xf32>
    %cst_25 = arith.constant dense<0.000000e+00> : vector<8x256xf32>
    %65 = tpu.matmul %64, %63, %cst_25 {dimension_numbers = #tpu.dot_dimension_numbers<[1], [0], [0], [1], [0, 0, 1, 1], [], []>} : vector<8x8xf32>, vector<8x256xf32>, vector<8x256xf32> -> vector<8x256xf32>
    %66 = arith.addf %57, %65 : vector<8x256xf32>
    %67 = vector.extract_strided_slice %1 {offsets = [0, 17], sizes = [8, 239], strides = [1, 1]} : vector<8x256xf32> to vector<8x239xf32>
    %68 = vector.extract_strided_slice %1 {offsets = [0, 0], sizes = [8, 17], strides = [1, 1]} : vector<8x256xf32> to vector<8x17xf32>
    %69 = tpu.concatenate %67, %68 in 1 : vector<8x239xf32>, vector<8x17xf32> -> vector<8x256xf32>
    %c8_26 = arith.constant 8 : index
    %c0_27 = arith.constant 0 : index
    %70 = vector.load %arg4[%c8_26, %c0_27] : memref<9x256xf32, #tpu.memory_space<vmem>>, vector<1x256xf32>
    %71 = vector.broadcast %70 : vector<1x256xf32> to vector<8x256xf32>
    %72 = arith.mulf %69, %71 : vector<8x256xf32>
    %c0_28 = arith.constant 0 : index
    %c64 = arith.constant 64 : index
    %73 = vector.load %arg2[%c0_28, %c64] : memref<8x72xf32, #tpu.memory_space<vmem>>, vector<8x8xf32>
    %cst_29 = arith.constant dense<0.000000e+00> : vector<8x256xf32>
    %74 = tpu.matmul %73, %72, %cst_29 {dimension_numbers = #tpu.dot_dimension_numbers<[1], [0], [0], [1], [0, 0, 1, 1], [], []>} : vector<8x8xf32>, vector<8x256xf32>, vector<8x256xf32> -> vector<8x256xf32>
    %75 = arith.addf %66, %74 : vector<8x256xf32>
    %cst_30 = arith.constant dense<0.000000e+00> : vector<8xf32>
    %76 = vector.multi_reduction <add>, %75, %cst_30 [1] : vector<8x256xf32> to vector<8xf32>
    %77 = vector.shape_cast %76 : vector<8xf32> to vector<8x1xf32>
    %cst_31 = arith.constant 2.560000e+02 : f32
    %78 = vector.broadcast %cst_31 : f32 to vector<8x1xf32>
    %79 = arith.divf %77, %78 : vector<8x1xf32>
    %80 = arith.mulf %75, %75 : vector<8x256xf32>
    %cst_32 = arith.constant dense<0.000000e+00> : vector<8xf32>
    %81 = vector.multi_reduction <add>, %80, %cst_32 [1] : vector<8x256xf32> to vector<8xf32>
    %82 = vector.shape_cast %81 : vector<8xf32> to vector<8x1xf32>
    %cst_33 = arith.constant 2.560000e+02 : f32
    %83 = vector.broadcast %cst_33 : f32 to vector<8x1xf32>
    %84 = arith.divf %82, %83 : vector<8x1xf32>
    %85 = arith.mulf %79, %79 : vector<8x1xf32>
    %86 = arith.subf %84, %85 : vector<8x1xf32>
    %cst_34 = arith.constant 0.000000e+00 : f32
    %87 = vector.broadcast %cst_34 : f32 to vector<8x1xf32>
    %88 = arith.maximumf %86, %87 : vector<8x1xf32>
    %89 = vector.broadcast %79 : vector<8x1xf32> to vector<8x256xf32>
    %90 = arith.subf %75, %89 : vector<8x256xf32>
    %cst_35 = arith.constant 9.99999974E-6 : f32
    %91 = vector.broadcast %cst_35 : f32 to vector<8x1xf32>
    %92 = arith.addf %88, %91 : vector<8x1xf32>
    %93 = math.rsqrt %92 : vector<8x1xf32>
    %94 = vector.broadcast %93 : vector<8x1xf32> to vector<8x256xf32>
    %95 = arith.mulf %90, %94 : vector<8x256xf32>
    %cst_36 = arith.constant 0.000000e+00 : f32
    %96 = vector.broadcast %cst_36 : f32 to vector<8x256xf32>
    %97 = arith.maximumf %95, %96 : vector<8x256xf32>
    %98 = vector.extract_strided_slice %97 {offsets = [0, 239], sizes = [8, 17], strides = [1, 1]} : vector<8x256xf32> to vector<8x17xf32>
    %99 = vector.extract_strided_slice %97 {offsets = [0, 0], sizes = [8, 239], strides = [1, 1]} : vector<8x256xf32> to vector<8x239xf32>
    %100 = tpu.concatenate %98, %99 in 1 : vector<8x17xf32>, vector<8x239xf32> -> vector<8x256xf32>
    %c0_37 = arith.constant 0 : index
    %c0_38 = arith.constant 0 : index
    %101 = vector.load %arg4[%c0_37, %c0_38] : memref<9x256xf32, #tpu.memory_space<vmem>>, vector<1x256xf32>
    %102 = vector.broadcast %101 : vector<1x256xf32> to vector<8x256xf32>
    %103 = arith.mulf %100, %102 : vector<8x256xf32>
    %c0_39 = arith.constant 0 : index
    %c0_40 = arith.constant 0 : index
    %104 = vector.load %arg3[%c0_39, %c0_40] : memref<8x72xf32, #tpu.memory_space<vmem>>, vector<8x8xf32>
    %cst_41 = arith.constant dense<0.000000e+00> : vector<8x256xf32>
    %105 = tpu.matmul %104, %103, %cst_41 {dimension_numbers = #tpu.dot_dimension_numbers<[1], [0], [0], [1], [0, 0, 1, 1], [], []>} : vector<8x8xf32>, vector<8x256xf32>, vector<8x256xf32> -> vector<8x256xf32>
    %106 = vector.extract_strided_slice %97 {offsets = [0, 240], sizes = [8, 16], strides = [1, 1]} : vector<8x256xf32> to vector<8x16xf32>
    %107 = vector.extract_strided_slice %97 {offsets = [0, 0], sizes = [8, 240], strides = [1, 1]} : vector<8x256xf32> to vector<8x240xf32>
    %108 = tpu.concatenate %106, %107 in 1 : vector<8x16xf32>, vector<8x240xf32> -> vector<8x256xf32>
    %c1_42 = arith.constant 1 : index
    %c0_43 = arith.constant 0 : index
    %109 = vector.load %arg4[%c1_42, %c0_43] : memref<9x256xf32, #tpu.memory_space<vmem>>, vector<1x256xf32>
    %110 = vector.broadcast %109 : vector<1x256xf32> to vector<8x256xf32>
    %111 = arith.mulf %108, %110 : vector<8x256xf32>
    %c0_44 = arith.constant 0 : index
    %c8_45 = arith.constant 8 : index
    %112 = vector.load %arg3[%c0_44, %c8_45] : memref<8x72xf32, #tpu.memory_space<vmem>>, vector<8x8xf32>
    %cst_46 = arith.constant dense<0.000000e+00> : vector<8x256xf32>
    %113 = tpu.matmul %112, %111, %cst_46 {dimension_numbers = #tpu.dot_dimension_numbers<[1], [0], [0], [1], [0, 0, 1, 1], [], []>} : vector<8x8xf32>, vector<8x256xf32>, vector<8x256xf32> -> vector<8x256xf32>
    %114 = arith.addf %105, %113 : vector<8x256xf32>
    %115 = vector.extract_strided_slice %97 {offsets = [0, 241], sizes = [8, 15], strides = [1, 1]} : vector<8x256xf32> to vector<8x15xf32>
    %116 = vector.extract_strided_slice %97 {offsets = [0, 0], sizes = [8, 241], strides = [1, 1]} : vector<8x256xf32> to vector<8x241xf32>
    %117 = tpu.concatenate %115, %116 in 1 : vector<8x15xf32>, vector<8x241xf32> -> vector<8x256xf32>
    %c2_47 = arith.constant 2 : index
    %c0_48 = arith.constant 0 : index
    %118 = vector.load %arg4[%c2_47, %c0_48] : memref<9x256xf32, #tpu.memory_space<vmem>>, vector<1x256xf32>
    %119 = vector.broadcast %118 : vector<1x256xf32> to vector<8x256xf32>
    %120 = arith.mulf %117, %119 : vector<8x256xf32>
    %c0_49 = arith.constant 0 : index
    %c16_50 = arith.constant 16 : index
    %121 = vector.load %arg3[%c0_49, %c16_50] : memref<8x72xf32, #tpu.memory_space<vmem>>, vector<8x8xf32>
    %cst_51 = arith.constant dense<0.000000e+00> : vector<8x256xf32>
    %122 = tpu.matmul %121, %120, %cst_51 {dimension_numbers = #tpu.dot_dimension_numbers<[1], [0], [0], [1], [0, 0, 1, 1], [], []>} : vector<8x8xf32>, vector<8x256xf32>, vector<8x256xf32> -> vector<8x256xf32>
    %123 = arith.addf %114, %122 : vector<8x256xf32>
    %124 = vector.extract_strided_slice %97 {offsets = [0, 255], sizes = [8, 1], strides = [1, 1]} : vector<8x256xf32> to vector<8x1xf32>
    %125 = vector.extract_strided_slice %97 {offsets = [0, 0], sizes = [8, 255], strides = [1, 1]} : vector<8x256xf32> to vector<8x255xf32>
    %126 = tpu.concatenate %124, %125 in 1 : vector<8x1xf32>, vector<8x255xf32> -> vector<8x256xf32>
    %c3_52 = arith.constant 3 : index
    %c0_53 = arith.constant 0 : index
    %127 = vector.load %arg4[%c3_52, %c0_53] : memref<9x256xf32, #tpu.memory_space<vmem>>, vector<1x256xf32>
    %128 = vector.broadcast %127 : vector<1x256xf32> to vector<8x256xf32>
    %129 = arith.mulf %126, %128 : vector<8x256xf32>
    %c0_54 = arith.constant 0 : index
    %c24_55 = arith.constant 24 : index
    %130 = vector.load %arg3[%c0_54, %c24_55] : memref<8x72xf32, #tpu.memory_space<vmem>>, vector<8x8xf32>
    %cst_56 = arith.constant dense<0.000000e+00> : vector<8x256xf32>
    %131 = tpu.matmul %130, %129, %cst_56 {dimension_numbers = #tpu.dot_dimension_numbers<[1], [0], [0], [1], [0, 0, 1, 1], [], []>} : vector<8x8xf32>, vector<8x256xf32>, vector<8x256xf32> -> vector<8x256xf32>
    %132 = arith.addf %123, %131 : vector<8x256xf32>
    %c0_57 = arith.constant 0 : index
    %c32_58 = arith.constant 32 : index
    %133 = vector.load %arg3[%c0_57, %c32_58] : memref<8x72xf32, #tpu.memory_space<vmem>>, vector<8x8xf32>
    %cst_59 = arith.constant dense<0.000000e+00> : vector<8x256xf32>
    %134 = tpu.matmul %133, %97, %cst_59 {dimension_numbers = #tpu.dot_dimension_numbers<[1], [0], [0], [1], [0, 0, 1, 1], [], []>} : vector<8x8xf32>, vector<8x256xf32>, vector<8x256xf32> -> vector<8x256xf32>
    %135 = arith.addf %132, %134 : vector<8x256xf32>
    %136 = vector.extract_strided_slice %97 {offsets = [0, 1], sizes = [8, 255], strides = [1, 1]} : vector<8x256xf32> to vector<8x255xf32>
    %137 = vector.extract_strided_slice %97 {offsets = [0, 0], sizes = [8, 1], strides = [1, 1]} : vector<8x256xf32> to vector<8x1xf32>
    %138 = tpu.concatenate %136, %137 in 1 : vector<8x255xf32>, vector<8x1xf32> -> vector<8x256xf32>
    %c5_60 = arith.constant 5 : index
    %c0_61 = arith.constant 0 : index
    %139 = vector.load %arg4[%c5_60, %c0_61] : memref<9x256xf32, #tpu.memory_space<vmem>>, vector<1x256xf32>
    %140 = vector.broadcast %139 : vector<1x256xf32> to vector<8x256xf32>
    %141 = arith.mulf %138, %140 : vector<8x256xf32>
    %c0_62 = arith.constant 0 : index
    %c40_63 = arith.constant 40 : index
    %142 = vector.load %arg3[%c0_62, %c40_63] : memref<8x72xf32, #tpu.memory_space<vmem>>, vector<8x8xf32>
    %cst_64 = arith.constant dense<0.000000e+00> : vector<8x256xf32>
    %143 = tpu.matmul %142, %141, %cst_64 {dimension_numbers = #tpu.dot_dimension_numbers<[1], [0], [0], [1], [0, 0, 1, 1], [], []>} : vector<8x8xf32>, vector<8x256xf32>, vector<8x256xf32> -> vector<8x256xf32>
    %144 = arith.addf %135, %143 : vector<8x256xf32>
    %145 = vector.extract_strided_slice %97 {offsets = [0, 15], sizes = [8, 241], strides = [1, 1]} : vector<8x256xf32> to vector<8x241xf32>
    %146 = vector.extract_strided_slice %97 {offsets = [0, 0], sizes = [8, 15], strides = [1, 1]} : vector<8x256xf32> to vector<8x15xf32>
    %147 = tpu.concatenate %145, %146 in 1 : vector<8x241xf32>, vector<8x15xf32> -> vector<8x256xf32>
    %c6_65 = arith.constant 6 : index
    %c0_66 = arith.constant 0 : index
    %148 = vector.load %arg4[%c6_65, %c0_66] : memref<9x256xf32, #tpu.memory_space<vmem>>, vector<1x256xf32>
    %149 = vector.broadcast %148 : vector<1x256xf32> to vector<8x256xf32>
    %150 = arith.mulf %147, %149 : vector<8x256xf32>
    %c0_67 = arith.constant 0 : index
    %c48_68 = arith.constant 48 : index
    %151 = vector.load %arg3[%c0_67, %c48_68] : memref<8x72xf32, #tpu.memory_space<vmem>>, vector<8x8xf32>
    %cst_69 = arith.constant dense<0.000000e+00> : vector<8x256xf32>
    %152 = tpu.matmul %151, %150, %cst_69 {dimension_numbers = #tpu.dot_dimension_numbers<[1], [0], [0], [1], [0, 0, 1, 1], [], []>} : vector<8x8xf32>, vector<8x256xf32>, vector<8x256xf32> -> vector<8x256xf32>
    %153 = arith.addf %144, %152 : vector<8x256xf32>
    %154 = vector.extract_strided_slice %97 {offsets = [0, 16], sizes = [8, 240], strides = [1, 1]} : vector<8x256xf32> to vector<8x240xf32>
    %155 = vector.extract_strided_slice %97 {offsets = [0, 0], sizes = [8, 16], strides = [1, 1]} : vector<8x256xf32> to vector<8x16xf32>
    %156 = tpu.concatenate %154, %155 in 1 : vector<8x240xf32>, vector<8x16xf32> -> vector<8x256xf32>
    %c7_70 = arith.constant 7 : index
    %c0_71 = arith.constant 0 : index
    %157 = vector.load %arg4[%c7_70, %c0_71] : memref<9x256xf32, #tpu.memory_space<vmem>>, vector<1x256xf32>
    %158 = vector.broadcast %157 : vector<1x256xf32> to vector<8x256xf32>
    %159 = arith.mulf %156, %158 : vector<8x256xf32>
    %c0_72 = arith.constant 0 : index
    %c56_73 = arith.constant 56 : index
    %160 = vector.load %arg3[%c0_72, %c56_73] : memref<8x72xf32, #tpu.memory_space<vmem>>, vector<8x8xf32>
    %cst_74 = arith.constant dense<0.000000e+00> : vector<8x256xf32>
    %161 = tpu.matmul %160, %159, %cst_74 {dimension_numbers = #tpu.dot_dimension_numbers<[1], [0], [0], [1], [0, 0, 1, 1], [], []>} : vector<8x8xf32>, vector<8x256xf32>, vector<8x256xf32> -> vector<8x256xf32>
    %162 = arith.addf %153, %161 : vector<8x256xf32>
    %163 = vector.extract_strided_slice %97 {offsets = [0, 17], sizes = [8, 239], strides = [1, 1]} : vector<8x256xf32> to vector<8x239xf32>
    %164 = vector.extract_strided_slice %97 {offsets = [0, 0], sizes = [8, 17], strides = [1, 1]} : vector<8x256xf32> to vector<8x17xf32>
    %165 = tpu.concatenate %163, %164 in 1 : vector<8x239xf32>, vector<8x17xf32> -> vector<8x256xf32>
    %c8_75 = arith.constant 8 : index
    %c0_76 = arith.constant 0 : index
    %166 = vector.load %arg4[%c8_75, %c0_76] : memref<9x256xf32, #tpu.memory_space<vmem>>, vector<1x256xf32>
    %167 = vector.broadcast %166 : vector<1x256xf32> to vector<8x256xf32>
    %168 = arith.mulf %165, %167 : vector<8x256xf32>
    %c0_77 = arith.constant 0 : index
    %c64_78 = arith.constant 64 : index
    %169 = vector.load %arg3[%c0_77, %c64_78] : memref<8x72xf32, #tpu.memory_space<vmem>>, vector<8x8xf32>
    %cst_79 = arith.constant dense<0.000000e+00> : vector<8x256xf32>
    %170 = tpu.matmul %169, %168, %cst_79 {dimension_numbers = #tpu.dot_dimension_numbers<[1], [0], [0], [1], [0, 0, 1, 1], [], []>} : vector<8x8xf32>, vector<8x256xf32>, vector<8x256xf32> -> vector<8x256xf32>
    %171 = arith.addf %162, %170 : vector<8x256xf32>
    %cst_80 = arith.constant dense<0.000000e+00> : vector<8xf32>
    %172 = vector.multi_reduction <add>, %171, %cst_80 [1] : vector<8x256xf32> to vector<8xf32>
    %173 = vector.shape_cast %172 : vector<8xf32> to vector<8x1xf32>
    %cst_81 = arith.constant 2.560000e+02 : f32
    %174 = vector.broadcast %cst_81 : f32 to vector<8x1xf32>
    %175 = arith.divf %173, %174 : vector<8x1xf32>
    %176 = arith.mulf %171, %171 : vector<8x256xf32>
    %cst_82 = arith.constant dense<0.000000e+00> : vector<8xf32>
    %177 = vector.multi_reduction <add>, %176, %cst_82 [1] : vector<8x256xf32> to vector<8xf32>
    %178 = vector.shape_cast %177 : vector<8xf32> to vector<8x1xf32>
    %cst_83 = arith.constant 2.560000e+02 : f32
    %179 = vector.broadcast %cst_83 : f32 to vector<8x1xf32>
    %180 = arith.divf %178, %179 : vector<8x1xf32>
    %181 = arith.mulf %175, %175 : vector<8x1xf32>
    %182 = arith.subf %180, %181 : vector<8x1xf32>
    %cst_84 = arith.constant 0.000000e+00 : f32
    %183 = vector.broadcast %cst_84 : f32 to vector<8x1xf32>
    %184 = arith.maximumf %182, %183 : vector<8x1xf32>
    %185 = vector.broadcast %175 : vector<8x1xf32> to vector<8x256xf32>
    %186 = arith.subf %171, %185 : vector<8x256xf32>
    %cst_85 = arith.constant 9.99999974E-6 : f32
    %187 = vector.broadcast %cst_85 : f32 to vector<8x1xf32>
    %188 = arith.addf %184, %187 : vector<8x1xf32>
    %189 = math.rsqrt %188 : vector<8x1xf32>
    %190 = vector.broadcast %189 : vector<8x1xf32> to vector<8x256xf32>
    %191 = arith.mulf %186, %190 : vector<8x256xf32>
    %c0_86 = arith.constant 0 : index
    %c0_87 = arith.constant 0 : index
    %c0_88 = arith.constant 0 : index
    %192 = vector.load %arg1[%c0_86, %c0_87, %c0_88] : memref<1x8x256xf32, #tpu.memory_space<vmem>>, vector<1x8x256xf32>
    %193 = vector.shape_cast %192 : vector<1x8x256xf32> to vector<8x256xf32>
    %194 = arith.addf %193, %191 : vector<8x256xf32>
    %c0_89 = arith.constant 0 : index
    %c0_90 = arith.constant 0 : index
    %c0_91 = arith.constant 0 : index
    %195 = vector.load %arg5[%c0_89, %c0_90, %c0_91] : memref<1x8x256xf32, #tpu.memory_space<vmem>>, vector<1x8x256xf32>
    %196 = vector.shape_cast %195 : vector<1x8x256xf32> to vector<8x256xf32>
    %197 = vector.shape_cast %194 : vector<8x256xf32> to vector<1x8x256xf32>
    tpu.vector_store %arg5[%c0_89, %c0_90, %c0_91], %197 {strides = array<i32>} : memref<1x8x256xf32, #tpu.memory_space<vmem>>, vector<1x8x256xf32>,
    return
  }
  func.func @transform_0(%arg0: i32) -> (i32, i32, i32) {
    %c0_i32 = arith.constant 0 : i32
    %c0_i32_0 = arith.constant 0 : i32
    %c0_i32_1 = arith.constant 0 : i32
    return %arg0, %c0_i32, %c0_i32_0 : i32, i32, i32
  }
  func.func @transform_1(%arg0: i32) -> (i32, i32) {
    %c0_i32 = arith.constant 0 : i32
    %c0_i32_0 = arith.constant 0 : i32
    %c0_i32_1 = arith.constant 0 : i32
    return %c0_i32, %c0_i32_0 : i32, i32
  }
  func.func @transform_2(%arg0: i32) -> (i32, i32) {
    %c0_i32 = arith.constant 0 : i32
    %c0_i32_0 = arith.constant 0 : i32
    %c0_i32_1 = arith.constant 0 : i32
    return %c0_i32, %c0_i32_0 : i32, i32
  }
  func.func @transform_3(%arg0: i32) -> (i32, i32) {
    %c0_i32 = arith.constant 0 : i32
    %c0_i32_0 = arith.constant 0 : i32
    %c0_i32_1 = arith.constant 0 : i32
    return %c0_i32, %c0_i32_0 : i32, i32
  }
  func.func @transform_4(%arg0: i32) -> (i32, i32, i32) {
    %c0_i32 = arith.constant 0 : i32
    %c0_i32_0 = arith.constant 0 : i32
    %c0_i32_1 = arith.constant 0 : i32
    return %arg0, %c0_i32, %c0_i32_0 : i32, i32, i32
  }
}

</mosaic_0001>

<bundles_post_ra>
// kernel: tpu_custom_call.1
= control target key start
LH: loop header
LB: loop body
LE: loop exit
PB: predicated region body
PF: predicated region fallthrough
CT: control target
= control target key end

     0   :  { %9 = vsyncpa [#allocation3], 0  ;;  %s3006_s0 = inlined_call_operand.hbm [shape: f32[2,8,256], index: 0, kind: input, shape index: {}]   ;;  %s3007_s1 = inlined_call_operand.hbm [shape: f32[8,72], index: 1, kind: input, shape index: {}]   ;;  %s3008_s2 = inlined_call_operand.hbm [shape: f32[8,72], index: 2, kind: input, shape index: {}]   ;;  %s3009_s3 = inlined_call_operand.hbm [shape: f32[9,256], index: 3, kind: input, shape index: {}]   ;;  %s3010_s4 = inlined_call_operand.hbm [shape: f32[2,8,256], index: 4, kind: output, shape index: {}]  }
   0x1   :  { %11 = vsyncpa [#allocation3 + $0x1], 0 }
   0x2   :  { %12 = vsyncpa [#allocation6], 0 }
   0x3   :  { %13 = vsyncpa [#allocation9], 0 }
   0x4   :  { %14 = vsyncpa [#allocation4], 0 }
   0x5   :  { %16 = vsyncpa [#allocation4 + $0x1], 0  ;;  %s2494_s15 = smov 0   ;;  %s2496_s16 = smov 0  }
   0x6   :  { %s2498_s17 = smov 0   ;;  %s2500_s18 = smov 0  }
   0x7 LB: > { %s2515_s19 = sadd.s32 4294967295, %s2444_s18   ;;  %s2085_s20 = sadd.s32 4294967294, %s2444_s18   ;;  %s2444_s18 = sphi %s2500_s18, %s3033_s18   ;;  %s2440_s17 = sphi %s2498_s17, %s3032_s17   ;;  %s2436_s16 = sphi %s2496_s16, %s3031_s16   ;;  %s2432_s15 = sphi %s2494_s15, %s3030_s15  }
   0x8   : > { %p42_p0 = scmp.ne.s32.totalorder %s2436_s16, %s2432_s15  ;;  %p3011_p1 = scmp.eq.s32.totalorder %s2515_s19, 0 }
   0x9   : > { %p135_p3 = scmp.eq.s32.totalorder %s2085_s20, 1  ;;  %p2086_p5 = scmp.ge.s32.totalorder %s2444_s18, 1 }
   0xa   : > { %p2524_p4 = por %p3011_p1, %p42_p0  ;;  %p142_p7 = scmp.lt.s32.totalorder %s2444_s18, 3 }
   0xb   : > { %p2529_p6 = por %p135_p3, %p42_p0  ;;  %s2446_s24 = smov [#allocation5]  }
   0xc   : > { %s3014_s21 = scalar_select %p2524_p4, 1, 0 }
   0xd   : > { %s3015_s22 = scalar_select %p2529_p6, 1, 0 }
   0xe   : > { %p2534_p8 = pnand %p2086_p5, %p142_p7  ;;  %s155_s25 = sshll.u32 %s2446_s24, 4  ;;  %s156_s25 = int_to_ptr.vmem [resolvable:$true] %s155_s25 }
   0xf   : > { %s2447_s26 = smov [#allocation7]   ;;  %s2448_s29 = smov [#allocation8]  }
  0x10   : > { %s3016_s23 = scalar_select %p2534_p8, 1, 0 }
  0x11   : > { %p2173_p10 = pneg %p2534_p8  ;;  %s166_s27 = sshll.u32 %s2447_s26, 4  ;;  %s2547_s27 = int_to_ptr.vmem [resolvable:$true] %s166_s27 }
  0x12   : > { %s176_s30 = sshll.u32 %s2448_s29, 4  ;;  %s2256_s7 = scalar_lea.hbm %s3007_s1, 128  ;;  %s2549_s30 = int_to_ptr.vmem [resolvable:$true] %s176_s30 }
  0x13   : > { %p2543_p11 = pnand %p2173_p10, %p3011_p1  ;;  %p2257_p12 = scmp.ne.s32.totalorder %s3007_s1, %s2256_s7 }
  0x14   : > { %p2263_p5 = scmp.lt.u32.totalorder %s2256_s7, %s3007_s1 }
  0x15   : > { %p2559_p13 = pneg %p2543_p11 }
  0x17   : > { %p2259_p0 = pnand %p2559_p13, %p2257_p12 }
  0x19   : > { %p2260_p3 = pneg %p2259_p0 }
  0x1b   : > { %p2265_p7 = pnand %p2263_p5, %p2260_p3 }
  0x1d   : > { %2268 = shalt.err (!%p2265_p7)
}
  0x1e   : > { %s2269_s13 = scalar_lea.vmem %s156_s25, 128  ;;  %p2277_p2 = scmp.lt.s32.totalorder %s156_s25, %s156_s25 }
  0x1f   : > { %p2270_p10 = scmp.ne.s32.totalorder %s156_s25, %s2269_s13  ;;  %p2278_p6 = scmp.lt.s32.totalorder %s2269_s13, %s2269_s13 }
  0x21   : > { %p2272_p9 = pnand %p2270_p10, %p2559_p13  ;;  %p2279_p4 = por %p2278_p6, %p2277_p2 }
  0x23   : > { %p2273_p1 = pneg %p2272_p9 }
  0x25   : > { %p2280_p8 = pnand %p2279_p4, %p2273_p1 }
  0x27   : > { %2283 = shalt.err (!%p2280_p8)
}
  0x28   : > { %2176 = dma.hbm_to_vmem [thread:$0]  (!%p2543_p11), %s3007_s1, 128, %s156_s25, [#allocation6]  }
  0x29   : > { %s2284_s29 = scalar_lea.hbm %s3008_s2, 128 }
  0x2a   : > { %p2285_p9 = scmp.ne.s32.totalorder %s3008_s2, %s2284_s29  ;;  %p2291_p1 = scmp.lt.u32.totalorder %s2284_s29, %s3008_s2 }
  0x2c   : > { %p2287_p12 = pnand %p2285_p9, %p2559_p13 }
  0x2e   : > { %p2288_p2 = pneg %p2287_p12 }
  0x30   : > { %p2293_p4 = pnand %p2291_p1, %p2288_p2 }
  0x32   : > { %2296 = shalt.err (!%p2293_p4)
}
  0x33   : > { %s2297_s25 = scalar_lea.vmem %s2547_s27, 128  ;;  %p2305_p3 = scmp.lt.s32.totalorder %s2547_s27, %s2547_s27 }
  0x34   : > { %p2298_p6 = scmp.ne.s32.totalorder %s2547_s27, %s2297_s25  ;;  %p2306_p5 = scmp.lt.s32.totalorder %s2297_s25, %s2297_s25 }
  0x36   : > { %p2300_p8 = pnand %p2298_p6, %p2559_p13  ;;  %p2307_p7 = por %p2306_p5, %p2305_p3 }
  0x38   : > { %p2301_p0 = pneg %p2300_p8 }
  0x3a   : > { %p2308_p10 = pnand %p2307_p7, %p2301_p0 }
  0x3c   : > { %2311 = shalt.err (!%p2308_p10)
}
  0x3d   : > { %2179 = dma.hbm_to_vmem [thread:$0]  (!%p2543_p11), %s3008_s2, 128, %s2547_s27, [#allocation6]  }
  0x3e   : > { %s2312_s14 = scalar_lea.hbm %s3009_s3, 512 }
  0x3f   : > { %p2313_p9 = scmp.ne.s32.totalorder %s3009_s3, %s2312_s14  ;;  %p2319_p1 = scmp.lt.u32.totalorder %s2312_s14, %s3009_s3 }
  0x41   : > { %p2315_p12 = pnand %p2313_p9, %p2559_p13 }
  0x43   : > { %p2316_p2 = pneg %p2315_p12 }
  0x45   : > { %p2321_p4 = pnand %p2319_p1, %p2316_p2 }
  0x47   : > { %2324 = shalt.err (!%p2321_p4)
}
  0x48   : > { %s2325_s27 = scalar_lea.vmem %s2549_s30, 512  ;;  %p2333_p3 = scmp.lt.s32.totalorder %s2549_s30, %s2549_s30 }
  0x49   : > { %p2326_p6 = scmp.ne.s32.totalorder %s2549_s30, %s2325_s27  ;;  %p2334_p5 = scmp.lt.s32.totalorder %s2325_s27, %s2325_s27 }
  0x4b   : > { %p2328_p8 = pnand %p2326_p6, %p2559_p13  ;;  %p2335_p7 = por %p2334_p5, %p2333_p3 }
  0x4d   : > { %p2329_p0 = pneg %p2328_p8 }
  0x4f   : > { %p2336_p10 = pnand %p2335_p7, %p2329_p0 }
  0x51   : > { %2339 = shalt.err (!%p2336_p10)
}
  0x52   : > { %s2449_s5 = smov 256   ;;  %s2450_s10 = smov 16  }
  0x53   : > { %2182 = dma.hbm_to_vmem [thread:$0]  (!%p2543_p11), %s3009_s3, 512, %s2549_s30, [#allocation9], %s2449_s5, %s2449_s5, %s2450_s10  }
  0x54   : > { %s2622_s8 = sadd.s32 1, %s2444_s18   ;;  %s29_s9 = sadd.s32 1, %s2440_s17 }
  0x55   : > { %s26_s25 = ssub.s32 %s2444_s18, %s2622_s8  ;;  %p36_p9 = scmp.ne.s32.totalorder %s2440_s17, %s2436_s16 }
  0x56   : > { %p27_p13 = scmp.eq.s32.totalorder %s26_s25, 0  ;;  %p37_p12 = scmp.eq.s32.totalorder %s2444_s18, 0 }
  0x57   : > { %p2194_p2 = scmp.lt.s32.totalorder %s2444_s18, 2  ;;  %p3019_p4 = scmp.eq.s32.totalorder %s2515_s19, 1 }
  0x58   : > { %s2632_s11 = scalar_select %p27_p13, %s2440_s17, %s29_s9  }
  0x59   : > { %p38_p1 = por %p37_p12, %p36_p9  ;;  %p2636_p6 = por %p3019_p4, %p36_p9 }
  0x5a   : > { %s190_s28 = sand.u32 1, %s2440_s17   ;;  %s2123_s13 = sshll.u32 %s2444_s18, 8 }
  0x5b   : > { %s2091_s30 = sshll.u32 %s190_s28, 4  ;;  %s2645_s24 = scalar_lea.hbm %s3006_s0, %s2123_s13 }
  0x5c   : > { %s194_s26 = scalar_lea.vmem [#allocation2], %s2091_s30  ;;  %p2647_p11 = pnand %p2194_p2, %p38_p1 }
  0x5d   : > { %s202_s29 = sshll.u32 %s194_s26, 4  ;;  %s191_s5 = scalar_lea.sflag [#allocation3], %s190_s28  ;;  %s2651_s29 = int_to_ptr.vmem [resolvable:$true] %s202_s29 }
  0x5e   : > { %s2340_s10 = scalar_lea.hbm %s2645_s24, 256  ;;  %p2342_p0 = pneg %p2647_p11 }
  0x5f   : > { %p2341_p8 = scmp.ne.s32.totalorder %s2645_s24, %s2340_s10  ;;  %s2345_s25 = scalar_lea.hbm %s3006_s0, 512 }
  0x60   : > { %p2346_p7 = scmp.lt.u32.totalorder %s2645_s24, %s3006_s0  ;;  %p2347_p10 = scmp.lt.u32.totalorder %s2345_s25, %s2340_s10 }
  0x61   : > { %p2343_p3 = pnand %p2342_p0, %p2341_p8  ;;  %p2349_p9 = scmp.lt.u32.totalorder %s2340_s10, %s2645_s24 }
  0x62   : > { %p2348_p13 = por %p2347_p10, %p2346_p7 }
  0x63   : > { %p2344_p5 = pneg %p2343_p3 }
  0x64   : > { %p2350_p12 = por %p2349_p9, %p2348_p13 }
  0x66   : > { %p2351_p2 = pnand %p2350_p12, %p2344_p5 }
  0x68   : > { %2354 = shalt.err (!%p2351_p2)
}
  0x69   : > { %s2355_s28 = scalar_lea.vmem %s2651_s29, 256  ;;  %s2451_s30 = smov [#allocation2]  }
  0x6a   : > { %p2356_p1 = scmp.ne.s32.totalorder %s2651_s29, %s2355_s28  ;;  %s2360_s14 = sshll.u32 %s2451_s30, 4  ;;  %s2361_s14 = int_to_ptr.vmem [resolvable:$false] %s2360_s14 }
  0x6b   : > { %s2362_s20 = scalar_lea.vmem %s2361_s14, 512  ;;  %p2363_p3 = scmp.lt.s32.totalorder %s2651_s29, %s2361_s14 }
  0x6c   : > { %p2358_p4 = pnand %p2356_p1, %p2342_p0  ;;  %p2364_p7 = scmp.lt.s32.totalorder %s2362_s20, %s2355_s28 }
  0x6e   : > { %p2359_p8 = pneg %p2358_p4  ;;  %p2365_p10 = por %p2364_p7, %p2363_p3 }
  0x70   : > { %p2366_p13 = pnand %p2365_p10, %p2359_p8 }
  0x72   : > { %2369 = shalt.err (!%p2366_p13)
}
  0x73   : > { %2186 = dma.hbm_to_vmem [thread:$0]  (!%p2647_p11), %s2645_s24, 256, %s2651_s29, %s191_s5  }
  0x74   : > { %p3022_p5 = scmp.ne.s32.totalorder %s3016_s23, 0 }
  0x75   : > { %s2681_s26 = sand.u32 (!%p3022_p5), 1, %s2436_s16   ;;  %p3023_p0 = scmp.ne.s32.totalorder (!%p3022_p5), %s3014_s21, 0 }
  0x76   : > { %211 = sbr.rel (%p3022_p5) target bundleno = 1285 (0x505), region = 36  ;;  %s2095_s10 = sshll.u32 (!%p3022_p5), %s2681_s26, 4 }
  0x77   : > { %s214_s6 = scalar_lea.sflag (!%p3022_p5), [#allocation3], %s2681_s26  ;;  %s217_s7 = scalar_lea.vmem (!%p3022_p5), [#allocation2], %s2095_s10 }
  0x7d   : > { %2415 = dma.done.wait (%p3023_p0), %s214_s6, 256  }
  0x7e   : > { %2417 = vsyncadd (%p3023_p0), %s214_s6, 4294967040  ;;  %p3024_p11 = scmp.eq.s32.totalorder %s2515_s19, 0 }
  0x80   : > { %2419 = dma.done.wait (%p3024_p11), [#allocation6], 256   ;;  %p3025_p9 = pmov %p3024_p11 }
  0x82   : > { %2421 = vsyncadd (%p3025_p9), [#allocation6], 4294967040  ;;  %p3026_p12 = pmov %p3025_p9 }
  0x83   : > { %p3027_p2 = pmov %p3025_p9 }
  0x84   : > { %2423 = dma.done.wait (%p3026_p12), [#allocation9], 512  }
  0x85   : > { %2425 = vsyncadd (%p3027_p2), [#allocation9], 4294966784  ;;  %v2452_v0 = vmov 0.0   ;;  %v2701_v1 = vld [vmem:[%s217_s7 + $0x8] sm:$0xff]  ;;  %v2703_v2 = vld [vmem:[#allocation5] sm:$0xff]  ;;  %s2453_s21 = smov 16   ;;  %v270_v4 = vlaneseq }
  0x86   : > { %378 = vmatprep.mubr.f32.mxu0 %v2452_v0  ;;  %1263 = vmatprep.mubr.f32.mxu1 %v2452_v0  ;;  %s2454_s23 = smov 120   ;;  %v2709_v3 = vld [vmem:[%s217_s7] sm:$0xff]  ;;  %s2455_s24 = smov 17   ;;  %vm288_vm0 = vcmask 130048   ;;  %vm263_vm1 = vcmask 138240   ;;  %vm311_vm2 = vcmask 64512  }
  0x87   : > { %283 = vrot.lane.b32.xlu0 %v2701_v1, %s2453_s21  ;;  %309 = vrot.lane.b32.xlu1 %v2703_v2, %s2454_s23  ;;  %s2456_s29 = smov 15   ;;  %s2457_s27 = smov 112   ;;  %v271_v5 = vshrl.u32 %v270_v4, 7  ;;  %v294_v8 = vld [vmem:[#allocation8 + $0x1] ss:$8 sm:$0x3] }
  0x88   : > { %s2458_s5 = smov 1   ;;  %s2459_s25 = smov 104   ;;  %v268_v13 = vld [vmem:[#allocation8] ss:$8 sm:$0x3]  ;;  %vm463_vm3 = vcmask 121856  }
  0x89   : > { %s2460_s9 = smov 96   ;;  %s2461_s13 = smov 127   ;;  %v2755_v6 = vsub.s32 1, %v271_v5  ;;  %v2757_v7 = vsub.s32 0, %v271_v5  ;;  %vm565_vm4 = vcmask 7168   ;;  %vm743_vm5 = vcmask 1039360  }
  0x8a   : > { %s2462_s28 = smov 88   ;;  %s2463_s30 = smov 113   ;;  %v469_v22 = vld [vmem:[#allocation8 + $0x2] ss:$8 sm:$0x3]  ;;  %vm845_vm6 = vcmask 924672  }
  0x8b   : > { %286 = vrot.lane.b32.xlu0 %v2709_v3, %s2453_s21  ;;  %257 = vrot.lane.b32.xlu1 %v2701_v1, %s2455_s24  ;;  %s2464_s14 = smov 80   ;;  %s2465_s20 = smov 72   ;;  %v2760_v11 = vrot.slane %v294_v8, %v2755_v6  ;;  %v2763_v12 = vrot.slane %v294_v8, %v2757_v7  ;;  %v2770_v20 = vrot.slane %v268_v13, %v2757_v7  ;;  %v571_v31 = vld [vmem:[#allocation8 + $0x3] ss:$8 sm:$0x3]  ;;  %vm947_vm7 = vcmask 916480  }
  0x8c   : > { %s2466_s6 = smov 111   ;;  %s2467_s7 = smov 64   ;;  %v2773_v21 = vrot.slane %v268_v13, %v2755_v6  ;;  %v2781_v29 = vrot.slane %v469_v22, %v2755_v6  ;;  %v2785_v30 = vrot.slane %v469_v22, %v2757_v7  ;;  %v2791_v37 = vrot.slane %v571_v31, %v2755_v6  ;;  %v750_v49 = vld [vmem:[#allocation8 + $0x5] ss:$8 sm:$0x3] }
  0x8d   : > { %v2800_v43 = vrot.slane %v571_v31, %v2757_v7  ;;  %v2808_v51 = vrot.slane %v750_v49, %v2755_v6  ;;  %v852_v56 = vld [vmem:[#allocation8 + $0x6] ss:$8 sm:$0x3]  ;;  %v2816_v58 = vrot.slane %v750_v49, %v2757_v7  ;;  %v954_v5 = vld [vmem:[#allocation8 + $0x7] ss:$8 sm:$0x3] }
  0x8e   : > { %v2820_v60 = vrot.slane %v852_v56, %v2755_v6  ;;  %v2832_v13 = vrot.slane %v954_v5, %v2755_v6  ;;  %vm1049_vm8 = vcmask 908288  }
  0x8f   : > { %261 = vrot.lane.b32.xlu0 %v2709_v3, %s2455_s24  ;;  %458 = vrot.lane.b32.xlu1 %v2701_v1, %s2456_s29 }
  0x93   : > { %461 = vrot.lane.b32.xlu0 %v2709_v3, %s2456_s29  ;;  %483 = vrot.lane.b32.xlu1 %v2703_v2, %s2457_s27 }
  0x97   : > { %563 = vrot.lane.b32.xlu1 %v2709_v3, %s2458_s5  ;;  %560 = vrot.lane.b32.xlu0 %v2701_v1, %s2458_s5 }
  0x9b   : > { %585 = vrot.lane.b32.xlu0 %v2703_v2, %s2459_s25  ;;  %662 = vrot.lane.b32.xlu1 %v2703_v2, %s2460_s9 }
  0x9f   : > { %741 = vrot.lane.b32.xlu1 %v2701_v1, %s2461_s13  ;;  %739 = vrot.lane.b32.xlu0 %v2709_v3, %s2461_s13 }
  0xa3   : > { %764 = vrot.lane.b32.xlu0 %v2703_v2, %s2462_s28  ;;  %841 = vrot.lane.b32.xlu1 %v2709_v3, %s2463_s30 }
  0xa7   : > { %843 = vrot.lane.b32.xlu0 %v2701_v1, %s2463_s30  ;;  %866 = vrot.lane.b32.xlu1 %v2703_v2, %s2464_s14 }
  0xab   : > { %945 = vrot.lane.b32.xlu1 %v2701_v1, %s2457_s27  ;;  %943 = vrot.lane.b32.xlu0 %v2709_v3, %s2457_s27 }
  0xaf   : > { %968 = vrot.lane.b32.xlu0 %v2703_v2, %s2465_s20  ;;  %1045 = vrot.lane.b32.xlu1 %v2709_v3, %s2466_s6 }
  0xb3   : > { %1047 = vrot.lane.b32.xlu0 %v2701_v1, %s2466_s6  ;;  %1070 = vrot.lane.b32.xlu1 %v2703_v2, %s2467_s7 }
  0xf9   : > { %v284_v9 = vpop.permute.xlu0 %283  ;;  %v310_v10 = vpop.permute.xlu1 %309 }
  0xfd   : > { %v287_v14 = vpop.permute.xlu0 %286  ;;  %v258_v15 = vpop.permute.xlu1 %257 }
  0xfe   : > { %v292_v16 = vsel %vm288_vm0, %v284_v9, %v287_v14  ;;  %v289_v17 = vsel %vm288_vm0, %v287_v14, %v284_v9  ;;  %v2828_v9 = vrot.slane %v852_v56, %v2757_v7 }
  0xff   : > { %v307_v18 = vmul.f32 %v2760_v11, %v289_v17  ;;  %v306_v19 = vmul.f32 %v2763_v12, %v292_v16 }
 0x101   : > { %314 = vmatprep.subr.mxu0 %v307_v18  ;;  %v262_v23 = vpop.permute.xlu0 %261  ;;  %v459_v24 = vpop.permute.xlu1 %458  ;;  %v1056_v18 = vld [vmem:[#allocation8 + $0x10] ss:$8 sm:$0x3] }
 0x102   : > { %315 = vmatpush1.msra.mxu0 %v306_v19  ;;  %v264_v25 = vsel %vm263_vm1, %v262_v23, %v258_v15  ;;  %v267_v26 = vsel %vm263_vm1, %v258_v15, %v262_v23  ;;  %v2840_v23 = vrot.slane %v954_v5, %v2757_v7  ;;  %v2852_v31 = vrot.slane %v1056_v18, %v2757_v7 }
 0x103   : > { %2100 = vmatmul.mubr.msk.f32.vlgmr.msra.gmra.mrb[0].mxu0 %vm311_vm2, %v310_v10  ;;  %v280_v27 = vmul.f32 %v2770_v20, %v267_v26  ;;  %v281_v28 = vmul.f32 %v2773_v21, %v264_v25  ;;  %v2844_v25 = vrot.slane %v1056_v18, %v2755_v6 }
 0x104   : > { %451 = vmatprep.mubr.f32.mxu0 %v2452_v0 }
 0x105   : > { %387 = vmatprep.subr.mxu0 %v281_v28  ;;  %v462_v32 = vpop.permute.xlu0 %461  ;;  %v484_v33 = vpop.permute.xlu1 %483 }
 0x106   : > { %388 = vmatpush1.msra.mxu0 %v280_v27  ;;  %v464_v34 = vsel %vm463_vm3, %v462_v32, %v459_v24  ;;  %v467_v35 = vsel %vm463_vm3, %v459_v24, %v462_v32 }
 0x107   : > { %v482_v36 = vmul.f32 %v2781_v29, %v464_v34  ;;  %v481_v38 = vmul.f32 %v2785_v30, %v467_v35 }
 0x109   : > { %487 = vmatprep.subr.mxu0 %v482_v36  ;;  %v564_v39 = vpop.permute.xlu1 %563  ;;  %v561_v40 = vpop.permute.xlu0 %560 }
 0x10a   : > { %v566_v41 = vsel %vm565_vm4, %v564_v39, %v561_v40  ;;  %v569_v44 = vsel %vm565_vm4, %v561_v40, %v564_v39 }
 0x10b   : > { %2101 = vmatmul.mubr.msk.f32.vlgmr.msra.gmra.mrb[0].mxu0 %vm311_vm2, %v2703_v2  ;;  %v584_v42 = vmul.f32 %v2791_v37, %v566_v41  ;;  %v583_v47 = vmul.f32 %v2800_v43, %v569_v44 }
 0x10c   : > { %488 = vmatpush1.msra.mxu0 %v481_v38  ;;  %551 = vmatprep.mubr.f32.mxu0 %v2452_v0 }
 0x10d   : > { %589 = vmatprep.subr.mxu0 %v584_v42  ;;  %v586_v45 = vpop.permute.xlu0 %585  ;;  %v663_v46 = vpop.permute.xlu1 %662 }
 0x111   : > { %v740_v48 = vpop.permute.xlu0 %739  ;;  %v742_v50 = vpop.permute.xlu1 %741 }
 0x112   : > { %v748_v53 = vsel %vm743_vm5, %v742_v50, %v740_v48  ;;  %v744_v59 = vsel %vm743_vm5, %v740_v48, %v742_v50 }
 0x113   : > { %2102 = vmatmul.mubr.msk.f32.vlgmr.msra.gmra.mrb[0].mxu0 %vm311_vm2, %v484_v33  ;;  %v763_v55 = vmul.f32 %v2808_v51, %v748_v53  ;;  %v762_v2 = vmul.f32 %v2816_v58, %v744_v59 }
 0x114   : > { %590 = vmatpush1.msra.mxu0 %v583_v47  ;;  %653 = vmatprep.mubr.f32.mxu0 %v2452_v0 }
 0x115   : > { %666 = vmatprep.subr.mxu0 %v2701_v1  ;;  %v765_v52 = vpop.permute.xlu0 %764  ;;  %v842_v54 = vpop.permute.xlu1 %841 }
 0x119   : > { %v844_v57 = vpop.permute.xlu0 %843  ;;  %v867_v61 = vpop.permute.xlu1 %866 }
 0x11a   : > { %v850_v62 = vsel %vm845_vm6, %v844_v57, %v842_v54  ;;  %v846_v10 = vsel %vm845_vm6, %v842_v54, %v844_v57  ;;  %v1182_v57 = vld [vmem:[#allocation7] sm:$0xff] }
 0x11b   : > { %2103 = vmatmul.mubr.msk.f32.vlgmr.msra.gmra.mrb[0].mxu0 %vm311_vm2, %v586_v45  ;;  %v865_v4 = vmul.f32 %v2820_v60, %v850_v62  ;;  %v864_v16 = vmul.f32 %v2828_v9, %v846_v10 }
 0x11c   : > { %667 = vmatpush1.msra.mxu0 %v2709_v3  ;;  %730 = vmatprep.mubr.f32.mxu0 %v2452_v0 }
 0x11d   : > { %768 = vmatprep.subr.mxu0 %v763_v55  ;;  %v944_v63 = vpop.permute.xlu0 %943  ;;  %v946_v8 = vpop.permute.xlu1 %945 }
 0x11e   : > { %v952_v15 = vsel %vm947_vm7, %v946_v8, %v944_v63  ;;  %v948_v24 = vsel %vm947_vm7, %v944_v63, %v946_v8 }
 0x11f   : > { %v967_v17 = vmul.f32 %v2832_v13, %v952_v15  ;;  %v966_v27 = vmul.f32 %v2840_v23, %v948_v24 }
 0x121   : > { %v969_v14 = vpop.permute.xlu0 %968  ;;  %v1046_v19 = vpop.permute.xlu1 %1045 }
 0x123   : > { %2104 = vmatmul.mubr.msk.f32.vlgmr.msra.gmra.mrb[0].mxu0 %vm311_vm2, %v663_v46 }
 0x124   : > { %769 = vmatpush1.msra.mxu0 %v762_v2  ;;  %832 = vmatprep.mubr.f32.mxu0 %v2452_v0 }
 0x125   : > { %870 = vmatprep.subr.mxu0 %v865_v4  ;;  %v1048_v22 = vpop.permute.xlu0 %1047  ;;  %v1071_v33 = vpop.permute.xlu1 %1070 }
 0x126   : > { %v1054_v26 = vsel %vm1049_vm8, %v1048_v22, %v1046_v19  ;;  %v1050_v32 = vsel %vm1049_vm8, %v1046_v19, %v1048_v22 }
 0x127   : > { %v1069_v28 = vmul.f32 %v2844_v25, %v1054_v26  ;;  %v1068_v6 = vmul.f32 %v2852_v31, %v1050_v32 }
 0x12b   : > { %2105 = vmatmul.mubr.msk.f32.vlgmr.msra.gmra.mrb[0].mxu0 %vm311_vm2, %v765_v52 }
 0x12c   : > { %871 = vmatpush1.msra.mxu0 %v864_v16  ;;  %934 = vmatprep.mubr.f32.mxu0 %v2452_v0 }
 0x12d   : > { %972 = vmatprep.subr.mxu0 %v967_v17 }
 0x133   : > { %2106 = vmatmul.mubr.msk.f32.vlgmr.msra.gmra.mrb[0].mxu0 %vm311_vm2, %v867_v61 }
 0x134   : > { %973 = vmatpush1.msra.mxu0 %v966_v27  ;;  %1036 = vmatprep.mubr.f32.mxu0 %v2452_v0 }
 0x135   : > { %1074 = vmatprep.subr.mxu0 %v1069_v28 }
 0x13b   : > { %2107 = vmatmul.mubr.msk.f32.vlgmr.msra.gmra.mrb[0].mxu0 %vm311_vm2, %v969_v14 }
 0x13c   : > { %1075 = vmatpush1.msra.mxu0 %v1068_v6  ;;  %1138 = vmatprep.mubr.f32.mxu0 %v2452_v0 }
 0x143   : > { %2108 = vmatmul.mubr.msk.f32.vlgmr.msra.gmra.mrb[0].mxu0 %vm311_vm2, %v1071_v33 }
 0x216   : > { %v1140_v34 = vpop.f32.mrb[0].mxu0 }
 0x217   : > { %v1142_v35 = vpop.f32.mrb[1].mxu0  ;;  %v1152_v36 = vmul.f32 %v1140_v34, %v1140_v34 }
 0x218   : > { %v1153_v38 = vmul.f32 %v1142_v35, %v1142_v35  ;;  %v1147_v39 = vadd.f32 %v1142_v35, %v1140_v34 }
 0x21a   : > { %1148 = vadd.xlane.f32.xlu0 %v1147_v39  ;;  %v1154_v7 = vadd.f32 %v1153_v38, %v1152_v36 }
 0x21c   : > { %1155 = vadd.xlane.f32.xlu1 %v1154_v7 }
 0x2a7   : > { %v1149_v40 = vpop.xlane.xlu0 %1148 }
 0x2a8   : > { %v1151_v41 = vmul.f32 0.00390625, %v1149_v40 }
 0x2a9   : > { %v1156_v42 = vpop.xlane.xlu1 %1155 }
 0x2aa   : > { %v1157_v44 = vmul.f32 0.00390625, %v1156_v42  ;;  %v1158_v45 = vmul.f32 %v1151_v41, %v1151_v41  ;;  %v1161_v49 = vsub.f32 %v1140_v34, %v1151_v41  ;;  %v1162_v50 = vsub.f32 %v1142_v35, %v1151_v41 }
 0x2ac   : > { %v1159_v46 = vsub.f32 %v1157_v44, %v1158_v45 }
 0x2ae   : > { %v1160_v47 = vmax.f32 %v1159_v46, 0.0 }
 0x2b0   : > { %v1163_v48 = vadd.f32 1e-05, %v1160_v47 }
 0x2b2   : > { %2252 = vrsqrt.f32 %v1163_v48 }
 0x2bc   : > { %v2253_v52 = vpop.eup %2252 }
 0x2bd   : > { %v1165_v53 = vmul.f32 %v2253_v52, %v1161_v49  ;;  %v1166_v54 = vmul.f32 %v2253_v52, %v1162_v50 }
 0x2bf   : > { %v2859_v55 = vmax.f32 %v1165_v53, 0.0  ;;  %v2861_v56 = vmax.f32 %v1166_v54, 0.0 }
 0x2c1   : > { %1183 = vrot.lane.b32.xlu0 %v2861_v56, %s2453_s21  ;;  %1186 = vrot.lane.b32.xlu1 %v2859_v55, %s2453_s21  ;;  %s2124_s21 = sshll.u32 %s2515_s19, 8  ;;  %s1972_s19 = scalar_lea.sflag [#allocation4], %s2681_s26 }
 0x2c5   : > { %1195 = vrot.lane.b32.xlu0 %v1182_v57, %s2454_s23  ;;  %1170 = vrot.lane.b32.xlu1 %v2861_v56, %s2455_s24  ;;  %s253_s23 = scalar_lea.vmem [#allocation10], %s2095_s10 }
 0x2c9   : > { %1174 = vrot.lane.b32.xlu0 %v2859_v55, %s2455_s24  ;;  %1343 = vrot.lane.b32.xlu1 %v2861_v56, %s2456_s29  ;;  %s1986_s24 = sshll.u32 %s253_s23, 4  ;;  %s2964_s24 = int_to_ptr.vmem [resolvable:$true] %s1986_s24 }
 0x2ca   : > { %s2370_s10 = scalar_lea.vmem %s2964_s24, 256 }
 0x2cb   : > { %p2371_p1 = scmp.ne.s32.totalorder %s2964_s24, %s2370_s10 }
 0x2cd   : > { %1346 = vrot.lane.b32.xlu0 %v2859_v55, %s2456_s29  ;;  %1354 = vrot.lane.b32.xlu1 %v1182_v57, %s2457_s27  ;;  %p2372_p4 = pnand %p2371_p1, %p2636_p6 }
 0x2cf   : > { %p2373_p8 = pneg %p2372_p4 }
 0x2d1   : > { %1431 = vrot.lane.b32.xlu0 %v2861_v56, %s2458_s5  ;;  %1434 = vrot.lane.b32.xlu1 %v2859_v55, %s2458_s5  ;;  %s2962_s5 = scalar_lea.hbm %s3010_s4, %s2124_s21 }
 0x2d5   : > { %1442 = vrot.lane.b32.xlu0 %v1182_v57, %s2459_s25  ;;  %1519 = vrot.lane.b32.xlu1 %v1182_v57, %s2460_s9  ;;  %s2468_s25 = smov [#allocation10]  }
 0x2d6   : > { %s2374_s9 = sshll.u32 %s2468_s25, 4  ;;  %s2375_s9 = int_to_ptr.vmem [resolvable:$false] %s2374_s9 }
 0x2d7   : > { %p2377_p3 = scmp.lt.s32.totalorder %s2964_s24, %s2375_s9 }
 0x2d9   : > { %1596 = vrot.lane.b32.xlu0 %v2859_v55, %s2461_s13  ;;  %1598 = vrot.lane.b32.xlu1 %v2861_v56, %s2461_s13  ;;  %s2376_s13 = scalar_lea.vmem %s2375_s9, 512 }
 0x2da   : > { %p2378_p7 = scmp.lt.s32.totalorder %s2376_s13, %s2370_s10 }
 0x2dc   : > { %p2379_p10 = por %p2378_p7, %p2377_p3 }
 0x2dd   : > { %1607 = vrot.lane.b32.xlu0 %v1182_v57, %s2462_s28  ;;  %1684 = vrot.lane.b32.xlu1 %v2859_v55, %s2463_s30 }
 0x2de   : > { %p2380_p13 = pnand %p2379_p10, %p2373_p8 }
 0x2e1   : > { %1686 = vrot.lane.b32.xlu0 %v2861_v56, %s2463_s30  ;;  %1695 = vrot.lane.b32.xlu1 %v1182_v57, %s2464_s14 }
 0x2e5   : > { %1772 = vrot.lane.b32.xlu0 %v2859_v55, %s2457_s27  ;;  %1774 = vrot.lane.b32.xlu1 %v2861_v56, %s2457_s27 }
 0x2e9   : > { %1783 = vrot.lane.b32.xlu0 %v1182_v57, %s2465_s20  ;;  %1860 = vrot.lane.b32.xlu1 %v2859_v55, %s2466_s6 }
 0x2ed   : > { %1862 = vrot.lane.b32.xlu0 %v2861_v56, %s2466_s6  ;;  %1871 = vrot.lane.b32.xlu1 %v1182_v57, %s2467_s7 }
 0x333   : > { %v1184_v59 = vpop.permute.xlu0 %1183  ;;  %v1187_v61 = vpop.permute.xlu1 %1186 }
 0x334   : > { %v1191_v62 = vsel %vm288_vm0, %v1184_v59, %v1187_v61  ;;  %v1188_v63 = vsel %vm288_vm0, %v1187_v61, %v1184_v59 }
 0x335   : > { %v1193_v2 = vmul.f32 %v1188_v63, %v2760_v11  ;;  %v1192_v4 = vmul.f32 %v1191_v62, %v2763_v12 }
 0x337   : > { %v1196_v5 = vpop.permute.xlu0 %1195  ;;  %1199 = vmatprep.subr.mxu1 %v1193_v2  ;;  %v1171_v8 = vpop.permute.xlu1 %1170 }
 0x338   : > { %1200 = vmatpush1.msra.mxu1 %v1192_v4 }
 0x339   : > { %2109 = vmatmul.mubr.msk.f32.vlgmr.msra.gmra.mrb[0].mxu1 %vm311_vm2, %v1196_v5 }
 0x33a   : > { %1336 = vmatprep.mubr.f32.mxu1 %v2452_v0 }
 0x33b   : > { %v1175_v10 = vpop.permute.xlu0 %1174  ;;  %v1344_v14 = vpop.permute.xlu1 %1343 }
 0x33c   : > { %v1176_v15 = vsel %vm263_vm1, %v1175_v10, %v1171_v8  ;;  %v1179_v16 = vsel %vm263_vm1, %v1171_v8, %v1175_v10 }
 0x33d   : > { %v1180_v17 = vmul.f32 %v1179_v16, %v2770_v20  ;;  %v1181_v11 = vmul.f32 %v1176_v15, %v2773_v21 }
 0x33f   : > { %v1347_v18 = vpop.permute.xlu0 %1346  ;;  %1272 = vmatprep.subr.mxu1 %v1181_v11  ;;  %v1355_v12 = vpop.permute.xlu1 %1354 }
 0x340   : > { %v1348_v19 = vsel %vm463_vm3, %v1347_v18, %v1344_v14  ;;  %v1351_v22 = vsel %vm463_vm3, %v1344_v14, %v1347_v18  ;;  %1273 = vmatpush1.msra.mxu1 %v1180_v17 }
 0x341   : > { %v1352_v24 = vmul.f32 %v1351_v22, %v2785_v30  ;;  %v1353_v26 = vmul.f32 %v1348_v19, %v2781_v29  ;;  %2110 = vmatmul.mubr.msk.f32.vlgmr.msra.gmra.mrb[0].mxu1 %vm311_vm2, %v1182_v57 }
 0x342   : > { %1422 = vmatprep.mubr.f32.mxu1 %v2452_v0 }
 0x343   : > { %v1432_v27 = vpop.permute.xlu0 %1431  ;;  %1358 = vmatprep.subr.mxu1 %v1353_v26  ;;  %v1435_v20 = vpop.permute.xlu1 %1434 }
 0x344   : > { %v1436_v21 = vsel %vm565_vm4, %v1435_v20, %v1432_v27  ;;  %1359 = vmatpush1.msra.mxu1 %v1352_v24  ;;  %v1439_v28 = vsel %vm565_vm4, %v1432_v27, %v1435_v20 }
 0x345   : > { %v1441_v32 = vmul.f32 %v1436_v21, %v2791_v37  ;;  %v1440_v30 = vmul.f32 %v1439_v28, %v2800_v43 }
 0x347   : > { %v1443_v6 = vpop.permute.xlu0 %1442  ;;  %1446 = vmatprep.subr.mxu1 %v1441_v32  ;;  %v1520_v33 = vpop.permute.xlu1 %1519 }
 0x349   : > { %2111 = vmatmul.mubr.msk.f32.vlgmr.msra.gmra.mrb[0].mxu1 %vm311_vm2, %v1355_v12 }
 0x34a   : > { %1447 = vmatpush1.msra.mxu1 %v1440_v30  ;;  %1510 = vmatprep.mubr.f32.mxu1 %v2452_v0 }
 0x34b   : > { %1523 = vmatprep.subr.mxu1 %v2861_v56  ;;  %v1597_v29 = vpop.permute.xlu0 %1596  ;;  %v1599_v34 = vpop.permute.xlu1 %1598 }
 0x34c   : > { %v1604_v35 = vsel %vm743_vm5, %v1599_v34, %v1597_v29  ;;  %v1600_v39 = vsel %vm743_vm5, %v1597_v29, %v1599_v34 }
 0x34d   : > { %v1606_v37 = vmul.f32 %v1604_v35, %v2808_v51  ;;  %v1605_v42 = vmul.f32 %v1600_v39, %v2816_v58 }
 0x34f   : > { %v1608_v36 = vpop.permute.xlu0 %1607  ;;  %v1685_v38 = vpop.permute.xlu1 %1684 }
 0x351   : > { %2112 = vmatmul.mubr.msk.f32.vlgmr.msra.gmra.mrb[0].mxu1 %vm311_vm2, %v1443_v6 }
 0x352   : > { %1524 = vmatpush1.msra.mxu1 %v2859_v55  ;;  %1587 = vmatprep.mubr.f32.mxu1 %v2452_v0 }
 0x353   : > { %1611 = vmatprep.subr.mxu1 %v1606_v37  ;;  %v1687_v43 = vpop.permute.xlu0 %1686  ;;  %v1696_v7 = vpop.permute.xlu1 %1695 }
 0x354   : > { %v1692_v40 = vsel %vm845_vm6, %v1687_v43, %v1685_v38  ;;  %v1688_v45 = vsel %vm845_vm6, %v1685_v38, %v1687_v43 }
 0x355   : > { %v1694_v44 = vmul.f32 %v1692_v40, %v2820_v60  ;;  %v1693_v48 = vmul.f32 %v1688_v45, %v2828_v9 }
 0x357   : > { %v1773_v41 = vpop.permute.xlu0 %1772  ;;  %v1775_v51 = vpop.permute.xlu1 %1774 }
 0x358   : > { %v1780_v47 = vsel %vm947_vm7, %v1775_v51, %v1773_v41  ;;  %v1776_v60 = vsel %vm947_vm7, %v1773_v41, %v1775_v51 }
 0x359   : > { %2113 = vmatmul.mubr.msk.f32.vlgmr.msra.gmra.mrb[0].mxu1 %vm311_vm2, %v1520_v33  ;;  %v1782_v49 = vmul.f32 %v1780_v47, %v2832_v13  ;;  %v1781_v53 = vmul.f32 %v1776_v60, %v2840_v23 }
 0x35a   : > { %1612 = vmatpush1.msra.mxu1 %v1605_v42  ;;  %1675 = vmatprep.mubr.f32.mxu1 %v2452_v0 }
 0x35b   : > { %1699 = vmatprep.subr.mxu1 %v1694_v44  ;;  %v1784_v46 = vpop.permute.xlu0 %1783  ;;  %v1861_v50 = vpop.permute.xlu1 %1860 }
 0x35f   : > { %v1863_v58 = vpop.permute.xlu0 %1862  ;;  %v1872_v55 = vpop.permute.xlu1 %1871 }
 0x360   : > { %v1868_v52 = vsel %vm1049_vm8, %v1863_v58, %v1861_v50  ;;  %v1864_v9 = vsel %vm1049_vm8, %v1861_v50, %v1863_v58 }
 0x361   : > { %2114 = vmatmul.mubr.msk.f32.vlgmr.msra.gmra.mrb[0].mxu1 %vm311_vm2, %v1608_v36  ;;  %v1870_v54 = vmul.f32 %v1868_v52, %v2844_v25  ;;  %v1869_v13 = vmul.f32 %v1864_v9, %v2852_v31 }
 0x362   : > { %1700 = vmatpush1.msra.mxu1 %v1693_v48  ;;  %1763 = vmatprep.mubr.f32.mxu1 %v2452_v0 }
 0x363   : > { %1787 = vmatprep.subr.mxu1 %v1782_v49 }
 0x369   : > { %2115 = vmatmul.mubr.msk.f32.vlgmr.msra.gmra.mrb[0].mxu1 %vm311_vm2, %v1696_v7 }
 0x36a   : > { %1788 = vmatpush1.msra.mxu1 %v1781_v53  ;;  %1851 = vmatprep.mubr.f32.mxu1 %v2452_v0 }
 0x36b   : > { %1875 = vmatprep.subr.mxu1 %v1870_v54 }
 0x371   : > { %2116 = vmatmul.mubr.msk.f32.vlgmr.msra.gmra.mrb[0].mxu1 %vm311_vm2, %v1784_v46 }
 0x372   : > { %1876 = vmatpush1.msra.mxu1 %v1869_v13  ;;  %1939 = vmatprep.mubr.f32.mxu1 %v2452_v0 }
 0x379   : > { %2117 = vmatmul.mubr.msk.f32.vlgmr.msra.gmra.mrb[0].mxu1 %vm311_vm2, %v1872_v55 }
 0x44c   : > { %v1941_v23 = vpop.f32.mrb[0].mxu1 }
 0x44d   : > { %v1943_v25 = vpop.f32.mrb[1].mxu1  ;;  %v1952_v56 = vmul.f32 %v1941_v23, %v1941_v23 }
 0x44e   : > { %v1953_v57 = vmul.f32 %v1943_v25, %v1943_v25  ;;  %v1948_v59 = vadd.f32 %v1943_v25, %v1941_v23 }
 0x450   : > { %1949 = vadd.xlane.f32.xlu0 %v1948_v59  ;;  %v1954_v61 = vadd.f32 %v1953_v57, %v1952_v56 }
 0x452   : > { %1955 = vadd.xlane.f32.xlu1 %v1954_v61 }
 0x4dd   : > { %v1950_v62 = vpop.xlane.xlu0 %1949 }
 0x4de   : > { %v1951_v31 = vmul.f32 0.00390625, %v1950_v62 }
 0x4df   : > { %v1956_v63 = vpop.xlane.xlu1 %1955 }
 0x4e0   : > { %v1957_v2 = vmul.f32 0.00390625, %v1956_v63  ;;  %v1958_v4 = vmul.f32 %v1951_v31, %v1951_v31  ;;  %v1961_v10 = vsub.f32 %v1941_v23, %v1951_v31  ;;  %v1962_v14 = vsub.f32 %v1943_v25, %v1951_v31 }
 0x4e2   : > { %v1959_v5 = vsub.f32 %v1957_v2, %v1958_v4 }
 0x4e4   : > { %v1960_v0 = vmax.f32 %v1959_v5, 0.0 }
 0x4e6   : > { %v1963_v8 = vadd.f32 1e-05, %v1960_v0 }
 0x4e8   : > { %2254 = vrsqrt.f32 %v1963_v8 }
 0x4f2   : > { %v2255_v15 = vpop.eup %2254 }
 0x4f3   : > { %v1965_v16 = vmul.f32 %v2255_v15, %v1961_v10  ;;  %v1966_v17 = vmul.f32 %v2255_v15, %v1962_v14 }
 0x4f5   : > { %v1967_v11 = vadd.f32 %v1965_v16, %v2709_v3  ;;  %v1968_v18 = vadd.f32 %v1966_v17, %v2701_v1 }
 0x4f7   : > { %1969 = vst [vmem:[%s253_s23] sm:$0xff] %v1967_v11  ;;  %1970 = vst [vmem:[%s253_s23 + $0x8] sm:$0xff] %v1968_v18 }
 0x4f8   : > { %2383 = shalt.err (!%p2380_p13)
}
 0x4f9   : > { %s2384_s26 = scalar_lea.hbm %s2962_s5, 256  ;;  %s2388_s14 = scalar_lea.hbm %s3010_s4, 512 }
 0x4fa   : > { %p2385_p5 = scmp.ne.s32.totalorder %s2962_s5, %s2384_s26  ;;  %p2389_p9 = scmp.lt.u32.totalorder %s2962_s5, %s3010_s4 }
 0x4fb   : > { %p2390_p12 = scmp.lt.u32.totalorder %s2388_s14, %s2384_s26  ;;  %p2392_p1 = scmp.lt.u32.totalorder %s2384_s26, %s2962_s5 }
 0x4fc   : > { %p2386_p0 = pnand %p2385_p5, %p2636_p6 }
 0x4fd   : > { %p2391_p2 = por %p2390_p12, %p2389_p9 }
 0x4fe   : > { %p2387_p11 = pneg %p2386_p0 }
 0x4ff   : > { %p2393_p4 = por %p2392_p1, %p2391_p2 }
 0x501   : > { %p2394_p8 = pnand %p2393_p4, %p2387_p11 }
 0x503   : > { %2397 = shalt.err (!%p2394_p8)
}
 0x504   : > { %2171 = dma.vmem_to_hbm [thread:$0]  (%p2636_p6), %s2964_s24, 256, %s2962_s5, %s1972_s19  }
 0x505 PF: > { %s1998_s7 = sand.u32 1, %s2432_s15   ;;  %p3028_p3 = scmp.ne.s32.totalorder %s3015_s22, 0 }
 0x506   : > { %p3029_p7 = scmp.ge.s32.totalorder %s2444_s18, 2  ;;  %s1999_s21 = scalar_lea.sflag [#allocation4], %s1998_s7 }
 0x508   : > { %p2188_p10 = pnand %p3029_p7, %p3028_p3 }
 0x50a   : > { %2427 = dma.done.wait (!%p2188_p10), %s1999_s21, 256  }
 0x50b   : > { %2429 = vsyncadd (!%p2188_p10), %s1999_s21, 4294967040  ;;  %p19_p13 = scmp.ge.s32.totalorder %s2622_s8, 4   ;;  %s3030_s15 = smov %s2436_s16 }
 0x50c   : > { %s3031_s16 = smov %s2440_s17  ;;  %s3032_s17 = smov %s2632_s11 }
 0x50d   : > { %s3033_s18 = smov %s2622_s8  ;;  %21 = sbr.rel (!%p19_p13) target bundleno = 7 (0x7), region = 100 }
 0x514   :  { %2004 = vsyncpa [#allocation3], 1 }
 0x515   :  { %2006 = vsyncpa [#allocation3 + $0x1], 1 }
 0x516   :  { %2007 = vsyncpa [#allocation6], 1 }
 0x517   :  { %2008 = vsyncpa [#allocation9], 1 }
 0x518   :  { %2009 = vsyncpa [#allocation4], 1 }
 0x519   :  { %2011 = vsyncpa [#allocation4 + $0x1], 1 }

</bundles_post_ra>
